<compile_context>
chip_gen: v5e
topology: v5e:2x2
jax: 0.10.0
libtpu: 0.0.40
codegen_flags: <defaults>
</compile_context>

<pallas_src>
import jax
import jax.numpy as jnp
from jax.experimental import pallas as pl
from jax.experimental.pallas import tpu as pltpu


IN_DIM = 33
_RAW_DIMS = [(33, 50), (50, 80), (80, 100), (100, 50), (50, 1)]


def _round8(n):
    return -(-n // 8) * 8


# padded hidden widths: 50->56, 80->80, 100->104, 50->56
H1, H2, H3, H4 = _round8(50), _round8(80), _round8(100), _round8(50)


def _mlp_kernel(x_ref,
                w1_ref, b1_ref,
                w2_ref, b2_ref,
                w3_ref, b3_ref,
                w4_ref, b4_ref,
                w5r_ref, b5_ref,
                o_ref):
    """Entire forward pass fused in VMEM: 5 matmuls + ReLUs + sigmoid."""

    def layer(h, w_ref, b_ref):
        # bf16 operands on the MXU, f32 accumulation; bias/ReLU stay f32.
        acc = jnp.dot(h.astype(w_ref.dtype), w_ref[...],
                      preferred_element_type=jnp.float32)
        return jnp.maximum(acc + b_ref[...], 0.0)

    h = layer(x_ref[...], w1_ref, b1_ref)   # (tm, 56)  f32
    h = layer(h, w2_ref, b2_ref)            # (tm, 80)
    h = layer(h, w3_ref, b3_ref)            # (tm, 104)
    h = layer(h, w4_ref, b4_ref)            # (tm, 56)

    # Final layer computed "transposed" so the logits come out lane-dense:
    #   w5r (8, 56) . h (tm, 56)^T -> (8, tm); only row 0 is real (rows 1..7
    #   of w5r are zero padding so the MXU lhs has a clean >=8-sublane shape).
    logits = jax.lax.dot_general(
        w5r_ref[...], h.astype(w5r_ref.dtype),
        dimension_numbers=(((1,), (1,)), ((), ())),
        preferred_element_type=jnp.float32)            # (8, tm) f32
    logits = logits[0:1, :] + b5_ref[...]              # (1, tm) f32
    o_ref[...] = jax.nn.sigmoid(logits).astype(o_ref.dtype)


def _prepare_params(params, compute_dtype):
    """Zero-pad hidden dims to multiples of 8 and cast weights to bf16.

    Padding is exact: padded output columns get zero weight + zero bias, so
    they stay 0 through ReLU and the padded rows of the next weight are zero.
    """
    def pad_w(w, rows, cols):
        r, c = w.shape
        return jnp.pad(w, ((0, rows - r), (0, cols - c))).astype(compute_dtype)

    def pad_b(b, cols):
        return jnp.pad(b, ((0, 0), (0, cols - b.shape[1]))).astype(jnp.float32)

    w1 = pad_w(params["w1"], IN_DIM, H1)
    b1 = pad_b(params["b1"], H1)
    w2 = pad_w(params["w2"], H1, H2)
    b2 = pad_b(params["b2"], H2)
    w3 = pad_w(params["w3"], H2, H3)
    b3 = pad_b(params["b3"], H3)
    w4 = pad_w(params["w4"], H3, H4)
    b4 = pad_b(params["b4"], H4)
    # Output layer (50, 1) as a row, padded to (8, 56); only row 0 is nonzero.
    w5r = jnp.zeros((8, H4), jnp.float32).at[0, :50].set(params["w5"][:, 0])
    w5r = w5r.astype(compute_dtype)
    b5 = params["b5"].astype(jnp.float32)              # (1, 1)
    return (w1, b1, w2, b2, w3, b3, w4, b4, w5r, b5)


def bin_cla_model_forward(x, params, *, tm=2048, compute_dtype=jnp.bfloat16):
    """x: (B, 33) float32. params: dict of transposed (in, out) weights/biases."""
    B, f_in = x.shape
    assert f_in == IN_DIM

    # Tile: multiple of 128 (lane-dense output block), >= 128, and shrink so
    # the grid keeps >= 2 steps when possible (v7x megacore batch sharding).
    tm = max(128, (int(tm) // 128) * 128)
    while tm > 128 and pl.cdiv(B, tm) < 2:
        tm //= 2
    n_tiles = pl.cdiv(B, tm)
    b_pad = n_tiles * tm

    # Ragged batch: zero-pad rows (results for padded rows are sliced off).
    x_p = x
    if b_pad != B:
        x_p = jnp.pad(x, ((0, b_pad - B), (0, 0)))
    x_p = x_p.astype(compute_dtype)

    weights = _prepare_params(params, compute_dtype)

    def resident(arr):
        # Whole-array block with a constant index map -> stays in VMEM across
        # the whole grid (no per-step DMA).
        return pl.BlockSpec(arr.shape, lambda i: (0,) * arr.ndim)

    in_specs = [pl.BlockSpec((tm, IN_DIM), lambda i: (i, 0))]
    in_specs += [resident(a) for a in weights]

    # Lane-dense output: one (1, tm) row per tile of a (1, B_pad) slab.
    out_spec = pl.BlockSpec((1, tm), lambda i: (0, i))

    flops = 2 * b_pad * sum(fi * fo for fi, fo in _RAW_DIMS)
    bytes_accessed = (int(x_p.size) * x_p.dtype.itemsize
                      + b_pad * 4
                      + sum(int(a.size) * a.dtype.itemsize for a in weights))
    cost = pl.CostEstimate(flops=flops,
                           transcendentals=b_pad,
                           bytes_accessed=bytes_accessed)

    y = pl.pallas_call(
        _mlp_kernel,
        out_shape=jax.ShapeDtypeStruct((1, b_pad), jnp.float32),
        grid_spec=pltpu.PrefetchScalarGridSpec(
            num_scalar_prefetch=0,
            grid=(n_tiles,),
            in_specs=in_specs,
            out_specs=out_spec,
        ),
        compiler_params=pltpu.CompilerParams(
            dimension_semantics=("parallel",)),
        cost_estimate=cost,
    )(x_p, *weights)

    return y.reshape(b_pad, 1)[:B]


def init_params(key):
    """Synthetic params with the PyTorch nn.Linear shapes, stored transposed
    as (in, out) weights plus (1, out) biases. U(-1/sqrt(fan_in), 1/sqrt(fan_in))."""
    params = {}
    for idx, (fan_in, fan_out) in enumerate(_RAW_DIMS, start=1):
        key, kw, kb = jax.random.split(key, 3)
        bound = 1.0 / (fan_in ** 0.5)
        params[f"w{idx}"] = jax.random.uniform(
            kw, (fan_in, fan_out), jnp.float32, minval=-bound, maxval=bound)
        params[f"b{idx}"] = jax.random.uniform(
            kb, (1, fan_out), jnp.float32, minval=-bound, maxval=bound)
    return params


def reference_forward_f32(x, params):
    h = x
    for idx in range(1, 5):
        h = jnp.maximum(h @ params[f"w{idx}"] + params[f"b{idx}"], 0.0)
    return jax.nn.sigmoid(h @ params["w5"] + params["b5"])


def reference_forward_bf16(x, params):
    """Pure-JAX reference using the kernel's exact recipe: bf16 matmul
    operands, f32 accumulation, f32 bias/ReLU/sigmoid."""
    h = x.astype(jnp.bfloat16)
    for idx in range(1, 5):
        w = params[f"w{idx}"].astype(jnp.bfloat16)
        h = jnp.maximum(
            jnp.dot(h, w, preferred_element_type=jnp.float32)
            + params[f"b{idx}"], 0.0)
        h = h.astype(jnp.bfloat16)
    w5 = params["w5"].astype(jnp.bfloat16)
    logits = jnp.dot(h, w5, preferred_element_type=jnp.float32) + params["b5"]
    return jax.nn.sigmoid(logits)


if __name__ == "__main__":
    key = jax.random.PRNGKey(0)
    key, kx = jax.random.split(key)

    # Small, deliberately ragged batch to exercise tile clamping + padding.
    B = 300
    x = jax.random.normal(kx, (B, 33), jnp.float32)
    params = init_params(key)

    out = jax.block_until_ready(bin_cla_model_forward(x, params))
    assert out.shape == (B, 1)

    # Strict check vs. a bf16-matched pure-JAX reference.
    ref_bf16 = reference_forward_bf16(x, params)
    assert jnp.allclose(out, ref_bf16, atol=1e-4, rtol=1e-4)

    # Loose sanity check vs. the full-f32 reference (bf16 quantisation error).
    ref_f32 = reference_forward_f32(x, params)
    assert jnp.allclose(out, ref_f32, atol=5e-2, rtol=5e-2)

    print("KERNEL_OK")
</pallas_src>

<mosaic_0001>
module attributes {stable_mosaic.version = 11 : i64} {
  func.func @_mlp_kernel(%arg0: i32, %arg1: memref<256x33xbf16, #tpu.memory_space<vmem>>, %arg2: memref<33x56xbf16, #tpu.memory_space<vmem>>, %arg3: memref<1x56xf32, #tpu.memory_space<vmem>>, %arg4: memref<56x80xbf16, #tpu.memory_space<vmem>>, %arg5: memref<1x80xf32, #tpu.memory_space<vmem>>, %arg6: memref<80x104xbf16, #tpu.memory_space<vmem>>, %arg7: memref<1x104xf32, #tpu.memory_space<vmem>>, %arg8: memref<104x56xbf16, #tpu.memory_space<vmem>>, %arg9: memref<1x56xf32, #tpu.memory_space<vmem>>, %arg10: memref<8x56xbf16, #tpu.memory_space<vmem>>, %arg11: memref<1x1xf32, #tpu.memory_space<vmem>>, %arg12: memref<1x256xf32, #tpu.memory_space<vmem>>) attributes {dimension_semantics = [#tpu.dimension_semantics<parallel>], iteration_bounds = array<i64: 2>, scalar_prefetch = 0 : i64, scratch_operands = 0 : i64, tpu.core_type = #tpu.core_type<tc>, window_params = [{transform_indices = @transform_0, window_bounds = array<i64: 256, 33>}, {pipeline_mode = #tpu.pipeline_mode<synchronous>, transform_indices = @transform_1, window_bounds = array<i64: 33, 56>}, {pipeline_mode = #tpu.pipeline_mode<synchronous>, transform_indices = @transform_2, window_bounds = array<i64: 1, 56>}, {pipeline_mode = #tpu.pipeline_mode<synchronous>, transform_indices = @transform_3, window_bounds = array<i64: 56, 80>}, {pipeline_mode = #tpu.pipeline_mode<synchronous>, transform_indices = @transform_4, window_bounds = array<i64: 1, 80>}, {pipeline_mode = #tpu.pipeline_mode<synchronous>, transform_indices = @transform_5, window_bounds = array<i64: 80, 104>}, {pipeline_mode = #tpu.pipeline_mode<synchronous>, transform_indices = @transform_6, window_bounds = array<i64: 1, 104>}, {pipeline_mode = #tpu.pipeline_mode<synchronous>, transform_indices = @transform_7, window_bounds = array<i64: 104, 56>}, {pipeline_mode = #tpu.pipeline_mode<synchronous>, transform_indices = @transform_8, window_bounds = array<i64: 1, 56>}, {pipeline_mode = #tpu.pipeline_mode<synchronous>, transform_indices = @transform_9, window_bounds = array<i64: 8, 56>}, {pipeline_mode = #tpu.pipeline_mode<synchronous>, transform_indices = @transform_10, window_bounds = array<i64: 1, 1>}, {transform_indices = @transform_11, window_bounds = array<i64: 1, 256>}]} {
    %c0 = arith.constant 0 : index
    %c0_0 = arith.constant 0 : index
    %0 = vector.load %arg1[%c0, %c0_0] : memref<256x33xbf16, #tpu.memory_space<vmem>>, vector<256x33xbf16>
    %c0_1 = arith.constant 0 : index
    %c0_2 = arith.constant 0 : index
    %1 = vector.load %arg2[%c0_1, %c0_2] : memref<33x56xbf16, #tpu.memory_space<vmem>>, vector<33x56xbf16>
    %cst = arith.constant dense<0.000000e+00> : vector<256x56xf32>
    %2 = tpu.matmul %0, %1, %cst {dimension_numbers = #tpu.dot_dimension_numbers<[1], [0], [0], [1], [0, 0, 1, 1], [], []>} : vector<256x33xbf16>, vector<33x56xbf16>, vector<256x56xf32> -> vector<256x56xf32>
    %c0_3 = arith.constant 0 : index
    %c0_4 = arith.constant 0 : index
    %3 = vector.load %arg3[%c0_3, %c0_4] : memref<1x56xf32, #tpu.memory_space<vmem>>, vector<1x56xf32>
    %4 = vector.broadcast %3 : vector<1x56xf32> to vector<256x56xf32>
    %5 = arith.addf %2, %4 : vector<256x56xf32>
    %cst_5 = arith.constant 0.000000e+00 : f32
    %6 = vector.broadcast %cst_5 : f32 to vector<256x56xf32>
    %7 = arith.maximumf %5, %6 : vector<256x56xf32>
    %8 = arith.truncf %7 : vector<256x56xf32> to vector<256x56xbf16>
    %c0_6 = arith.constant 0 : index
    %c0_7 = arith.constant 0 : index
    %9 = vector.load %arg4[%c0_6, %c0_7] : memref<56x80xbf16, #tpu.memory_space<vmem>>, vector<56x80xbf16>
    %cst_8 = arith.constant dense<0.000000e+00> : vector<256x80xf32>
    %10 = tpu.matmul %8, %9, %cst_8 {dimension_numbers = #tpu.dot_dimension_numbers<[1], [0], [0], [1], [0, 0, 1, 1], [], []>} : vector<256x56xbf16>, vector<56x80xbf16>, vector<256x80xf32> -> vector<256x80xf32>
    %c0_9 = arith.constant 0 : index
    %c0_10 = arith.constant 0 : index
    %11 = vector.load %arg5[%c0_9, %c0_10] : memref<1x80xf32, #tpu.memory_space<vmem>>, vector<1x80xf32>
    %12 = vector.broadcast %11 : vector<1x80xf32> to vector<256x80xf32>
    %13 = arith.addf %10, %12 : vector<256x80xf32>
    %cst_11 = arith.constant 0.000000e+00 : f32
    %14 = vector.broadcast %cst_11 : f32 to vector<256x80xf32>
    %15 = arith.maximumf %13, %14 : vector<256x80xf32>
    %16 = arith.truncf %15 : vector<256x80xf32> to vector<256x80xbf16>
    %c0_12 = arith.constant 0 : index
    %c0_13 = arith.constant 0 : index
    %17 = vector.load %arg6[%c0_12, %c0_13] : memref<80x104xbf16, #tpu.memory_space<vmem>>, vector<80x104xbf16>
    %cst_14 = arith.constant dense<0.000000e+00> : vector<256x104xf32>
    %18 = tpu.matmul %16, %17, %cst_14 {dimension_numbers = #tpu.dot_dimension_numbers<[1], [0], [0], [1], [0, 0, 1, 1], [], []>} : vector<256x80xbf16>, vector<80x104xbf16>, vector<256x104xf32> -> vector<256x104xf32>
    %c0_15 = arith.constant 0 : index
    %c0_16 = arith.constant 0 : index
    %19 = vector.load %arg7[%c0_15, %c0_16] : memref<1x104xf32, #tpu.memory_space<vmem>>, vector<1x104xf32>
    %20 = vector.broadcast %19 : vector<1x104xf32> to vector<256x104xf32>
    %21 = arith.addf %18, %20 : vector<256x104xf32>
    %cst_17 = arith.constant 0.000000e+00 : f32
    %22 = vector.broadcast %cst_17 : f32 to vector<256x104xf32>
    %23 = arith.maximumf %21, %22 : vector<256x104xf32>
    %24 = arith.truncf %23 : vector<256x104xf32> to vector<256x104xbf16>
    %c0_18 = arith.constant 0 : index
    %c0_19 = arith.constant 0 : index
    %25 = vector.load %arg8[%c0_18, %c0_19] : memref<104x56xbf16, #tpu.memory_space<vmem>>, vector<104x56xbf16>
    %cst_20 = arith.constant dense<0.000000e+00> : vector<256x56xf32>
    %26 = tpu.matmul %24, %25, %cst_20 {dimension_numbers = #tpu.dot_dimension_numbers<[1], [0], [0], [1], [0, 0, 1, 1], [], []>} : vector<256x104xbf16>, vector<104x56xbf16>, vector<256x56xf32> -> vector<256x56xf32>
    %c0_21 = arith.constant 0 : index
    %c0_22 = arith.constant 0 : index
    %27 = vector.load %arg9[%c0_21, %c0_22] : memref<1x56xf32, #tpu.memory_space<vmem>>, vector<1x56xf32>
    %28 = vector.broadcast %27 : vector<1x56xf32> to vector<256x56xf32>
    %29 = arith.addf %26, %28 : vector<256x56xf32>
    %cst_23 = arith.constant 0.000000e+00 : f32
    %30 = vector.broadcast %cst_23 : f32 to vector<256x56xf32>
    %31 = arith.maximumf %29, %30 : vector<256x56xf32>
    %c0_24 = arith.constant 0 : index
    %c0_25 = arith.constant 0 : index
    %32 = vector.load %arg10[%c0_24, %c0_25] : memref<8x56xbf16, #tpu.memory_space<vmem>>, vector<8x56xbf16>
    %33 = arith.truncf %31 : vector<256x56xf32> to vector<256x56xbf16>
    %cst_26 = arith.constant dense<0.000000e+00> : vector<8x256xf32>
    %34 = tpu.matmul %32, %33, %cst_26 {dimension_numbers = #tpu.dot_dimension_numbers<[1], [1], [0], [0], [0, 0, 1, 0], [], []>} : vector<8x56xbf16>, vector<256x56xbf16>, vector<8x256xf32> -> vector<8x256xf32>
    %35 = vector.extract_strided_slice %34 {offsets = [0, 0], sizes = [1, 256], strides = [1, 1]} : vector<8x256xf32> to vector<1x256xf32>
    %c0_27 = arith.constant 0 : index
    %c0_28 = arith.constant 0 : index
    %36 = vector.load %arg11[%c0_27, %c0_28] : memref<1x1xf32, #tpu.memory_space<vmem>>, vector<1x1xf32>
    %37 = vector.broadcast %36 : vector<1x1xf32> to vector<1x256xf32>
    %38 = arith.addf %35, %37 : vector<1x256xf32>
    %39 = arith.negf %38 : vector<1x256xf32>
    %40 = math.exp %39 : vector<1x256xf32>
    %cst_29 = arith.constant 1.000000e+00 : f32
    %41 = vector.broadcast %cst_29 : f32 to vector<1x256xf32>
    %42 = arith.addf %41, %40 : vector<1x256xf32>
    %43 = arith.divf %41, %42 : vector<1x256xf32>
    %c0_30 = arith.constant 0 : index
    %c0_31 = arith.constant 0 : index
    %44 = vector.load %arg12[%c0_30, %c0_31] : memref<1x256xf32, #tpu.memory_space<vmem>>, vector<1x256xf32>
    tpu.vector_store %arg12[%c0_30, %c0_31], %43 {strides = array<i32>} : memref<1x256xf32, #tpu.memory_space<vmem>>, vector<1x256xf32>,
    return
  }
  func.func @transform_0(%arg0: i32) -> (i32, i32) {
    %c0_i32 = arith.constant 0 : i32
    %c0_i32_0 = arith.constant 0 : i32
    return %arg0, %c0_i32 : i32, i32
  }
  func.func @transform_1(%arg0: i32) -> (i32, i32) {
    %c0_i32 = arith.constant 0 : i32
    %c0_i32_0 = arith.constant 0 : i32
    %c0_i32_1 = arith.constant 0 : i32
    return %c0_i32, %c0_i32_0 : i32, i32
  }
  func.func @transform_2(%arg0: i32) -> (i32, i32) {
    %c0_i32 = arith.constant 0 : i32
    %c0_i32_0 = arith.constant 0 : i32
    %c0_i32_1 = arith.constant 0 : i32
    return %c0_i32, %c0_i32_0 : i32, i32
  }
  func.func @transform_3(%arg0: i32) -> (i32, i32) {
    %c0_i32 = arith.constant 0 : i32
    %c0_i32_0 = arith.constant 0 : i32
    %c0_i32_1 = arith.constant 0 : i32
    return %c0_i32, %c0_i32_0 : i32, i32
  }
  func.func @transform_4(%arg0: i32) -> (i32, i32) {
    %c0_i32 = arith.constant 0 : i32
    %c0_i32_0 = arith.constant 0 : i32
    %c0_i32_1 = arith.constant 0 : i32
    return %c0_i32, %c0_i32_0 : i32, i32
  }
  func.func @transform_5(%arg0: i32) -> (i32, i32) {
    %c0_i32 = arith.constant 0 : i32
    %c0_i32_0 = arith.constant 0 : i32
    %c0_i32_1 = arith.constant 0 : i32
    return %c0_i32, %c0_i32_0 : i32, i32
  }
  func.func @transform_6(%arg0: i32) -> (i32, i32) {
    %c0_i32 = arith.constant 0 : i32
    %c0_i32_0 = arith.constant 0 : i32
    %c0_i32_1 = arith.constant 0 : i32
    return %c0_i32, %c0_i32_0 : i32, i32
  }
  func.func @transform_7(%arg0: i32) -> (i32, i32) {
    %c0_i32 = arith.constant 0 : i32
    %c0_i32_0 = arith.constant 0 : i32
    %c0_i32_1 = arith.constant 0 : i32
    return %c0_i32, %c0_i32_0 : i32, i32
  }
  func.func @transform_8(%arg0: i32) -> (i32, i32) {
    %c0_i32 = arith.constant 0 : i32
    %c0_i32_0 = arith.constant 0 : i32
    %c0_i32_1 = arith.constant 0 : i32
    return %c0_i32, %c0_i32_0 : i32, i32
  }
  func.func @transform_9(%arg0: i32) -> (i32, i32) {
    %c0_i32 = arith.constant 0 : i32
    %c0_i32_0 = arith.constant 0 : i32
    %c0_i32_1 = arith.constant 0 : i32
    return %c0_i32, %c0_i32_0 : i32, i32
  }
  func.func @transform_10(%arg0: i32) -> (i32, i32) {
    %c0_i32 = arith.constant 0 : i32
    %c0_i32_0 = arith.constant 0 : i32
    %c0_i32_1 = arith.constant 0 : i32
    return %c0_i32, %c0_i32_0 : i32, i32
  }
  func.func @transform_11(%arg0: i32) -> (i32, i32) {
    %c0_i32 = arith.constant 0 : i32
    %c0_i32_0 = arith.constant 0 : i32
    return %c0_i32, %arg0 : i32, i32
  }
}

</mosaic_0001>

<bundles_post_ra>
// kernel: tpu_custom_call.1
= control target key start
LH: loop header
LB: loop body
LE: loop exit
PB: predicated region body
PF: predicated region fallthrough
CT: control target
= control target key end

     0   :  { %s2473_s0 = inlined_call_operand.vmem [shape: bf16[512,33], index: 0, kind: input, shape index: {}]   ;;  %s2474_s1 = inlined_call_operand.vmem [shape: bf16[33,56], index: 1, kind: input, shape index: {}]   ;;  %s2475_s2 = inlined_call_operand.vmem [shape: f32[1,56], index: 2, kind: input, shape index: {}]   ;;  %s2476_s3 = inlined_call_operand.vmem [shape: bf16[56,80], index: 3, kind: input, shape index: {}]   ;;  %s2477_s4 = inlined_call_operand.vmem [shape: f32[1,80], index: 4, kind: input, shape index: {}]   ;;  %s2478_s5 = inlined_call_operand.vmem [shape: bf16[80,104], index: 5, kind: input, shape index: {}]   ;;  %s2479_s6 = inlined_call_operand.vmem [shape: f32[1,104], index: 6, kind: input, shape index: {}]   ;;  %s2480_s7 = inlined_call_operand.vmem [shape: bf16[104,56], index: 7, kind: input, shape index: {}]   ;;  %s2481_s8 = inlined_call_operand.vmem [shape: f32[1,56], index: 8, kind: input, shape index: {}]   ;;  %s2482_s9 = inlined_call_operand.vmem [shape: bf16[8,56], index: 9, kind: input, shape index: {}]   ;;  %s2483_s10 = inlined_call_operand.<no memory space> [shape: f32[1,1], index: 10, kind: input, shape index: {}]   ;;  %s2484_s11 = inlined_call_operand.hbm [shape: f32[1,512], index: 11, kind: output, shape index: {}]  }
   0x1   :  { %v16_v0 = vstv %s2483_s10 }
   0x2   :  { %17 = vst [vmem:[#allocation2] sm:$0x1] %v16_v0 }
   0x3   :  { %18 = vsyncpa [#allocation4], 0 }
   0x4   :  { %20 = vsyncpa [#allocation4 + $0x1], 0  ;;  %s2046_s19 = smov 0   ;;  %s2048_s20 = smov 0  }
   0x5   :  { %s2050_s21 = smov 0   ;;  %s2052_s22 = smov 0  }
   0x6 LB: > { %s2067_s10 = sadd.s32 4294967295, %s1980_s22   ;;  %s1626_s23 = sadd.s32 4294967294, %s1980_s22   ;;  %s1980_s22 = sphi %s2052_s22, %s2492_s22   ;;  %s1976_s21 = sphi %s2050_s21, %s2491_s21   ;;  %s1972_s20 = sphi %s2048_s20, %s2490_s20   ;;  %s1968_s19 = sphi %s2046_s19, %s2489_s19  }
   0x7   : > { %s2071_s24 = sadd.s32 1, %s1980_s22   ;;  %s269_s25 = sadd.s32 1, %s1976_s21 }
   0x8   : > { %s266_s26 = ssub.s32 %s1980_s22, %s2071_s24  ;;  %p279_p0 = scmp.ne.s32.totalorder %s1976_s21, %s1972_s20 }
   0x9   : > { %p267_p1 = scmp.eq.s32.totalorder %s266_s26, 0  ;;  %p280_p2 = scmp.eq.s32.totalorder %s2067_s10, 1 }
   0xa   : > { %p285_p3 = scmp.ne.s32.totalorder %s1972_s20, %s1968_s19  ;;  %p286_p4 = scmp.eq.s32.totalorder %s1626_s23, 1 }
   0xb   : > { %s2082_s27 = scalar_select %p267_p1, %s1976_s21, %s269_s25  }
   0xc   : > { %p2084_p5 = por %p280_p2, %p279_p0  ;;  %p2088_p6 = por %p286_p4, %p285_p3 }
   0xd   : > { %p1629_p7 = scmp.ge.s32.totalorder %s1980_s22, 1  ;;  %p343_p8 = scmp.lt.s32.totalorder %s1980_s22, 3 }
   0xf   : > { %p344_p9 = pnand %p1629_p7, %p343_p8 }
  0x10   : > { %s1631_s13 = sshll.u32 (!%p344_p9), %s2067_s10, 5  ;;  %s1830_s12 = sshll.u32 (!%p344_p9), %s2067_s10, 1 }
  0x11   : > { %347 = sbr.rel (%p344_p9) target bundleno = 1078 (0x436), region = 64  ;;  %p384_p10 = scmp.lt.s32.totalorder (!%p344_p9), %s1631_s13, 63 }
  0x12   : > { %s1562_s15 = scalar_lea.hbm (!%p344_p9), %s2484_s11, %s1830_s12 }
  0x13   : > { %s1566_s17 = sshll.u32 (!%p344_p9), %s1562_s15, 4  ;;  %s1567_s17 = int_to_ptr.hbm [resolvable:$true] %s1566_s17 }
  0x14   : > { %s1932_s23 = sshra.s32 (!%p344_p9), %s1567_s17, 4  ;;  %s1933_s23 = int_to_ptr.hbm [resolvable:$true] %s1932_s23 }
  0x15   : > { %s1934_s25 = scalar_lea.hbm (!%p344_p9), %s1933_s23, 2  ;;  %p1939_p0 = scmp.lt.s32.totalorder (!%p344_p9), %s1933_s23, %s2484_s11 }
  0x16   : > { %v427_v1 = vld [vmem:[%s2474_s1 + $0x10] sm:$0x1]  ;;  %vm576_vm0 = vcmask 1040384   ;;  %v1982_v3 = vmov 0   ;;  %s2494_s13 = smov (!%p384_p10, %s1631_s13), 63  ;;  %v1850_v7 = vld [vmem:[%s2474_s1 + $0x8] sm:$0xff]  ;;  %p1935_p11 = scmp.ne.s32.totalorder %s1933_s23, %s1934_s25 }
  0x17   : > { %v521_v2 = vunpack.c.l.b16 %v427_v1  ;;  %1905 = vset.pattern.permute.xlu0 %v1982_v3  ;;  %v578_v4 = vsel %vm576_vm0, 65535, %v1982_v3  ;;  %s1632_s16 = sshll.u32 %s2494_s13, 2  ;;  %v1849_v8 = vld [vmem:[%s2474_s1] sm:$0xff]  ;;  %vm527_vm1 = vcmask 269312   ;;  %v725_v15 = vld [vmem:[%s2476_s3 + $0x18] sm:$0xf] }
  0x18   : > { %s2108_s26 = scalar_lea.vmem %s2473_s0, %s1632_s16  ;;  %v743_v16 = vunpack.c.l.b16 %v725_v15  ;;  %vm800_vm2 = vcmask 1043456   ;;  %v1853_v20 = vld [vmem:[%s2476_s3 + $0x10] sm:$0xff]  ;;  %v1852_v21 = vld [vmem:[%s2476_s3 + $0x8] sm:$0xff]  ;;  %v1851_v22 = vld [vmem:[%s2476_s3] sm:$0xff]  ;;  %vm751_vm3 = vcmask 457728   ;;  %vm985_vm4 = vcmask 654336   ;;  %p1936_p12 = pnand %p1935_p11, %p2084_p5 }
  0x19   : > { %v524_v5 = vpack.c.b16 %v521_v2, %v521_v2  ;;  %v1833_v9 = vld [vmem:[%s2108_s26] sm:$0xff]  ;;  %v1834_v10 = vld [vmem:[%s2108_s26 + $0x8] sm:$0xff]  ;;  %v1835_v11 = vld [vmem:[%s2108_s26 + $0x10] sm:$0xff]  ;;  %vm1227_vm5 = vcmask 850944   ;;  %s1938_s13 = scalar_lea.hbm %s2484_s11, 4 }
  0x1a   : > { %v1836_v12 = vld [vmem:[%s2108_s26 + $0x18] sm:$0xff]  ;;  %v1837_v13 = vld [vmem:[%s2108_s26 + $0x20] sm:$0xff]  ;;  %v1838_v14 = vld [vmem:[%s2108_s26 + $0x28] sm:$0xff]  ;;  %v747_v17 = vpack.c.b16 %v743_v16, %v743_v16  ;;  %p1937_p13 = pneg %p1936_p12  ;;  %p1940_p1 = scmp.lt.s32.totalorder %s1938_s13, %s1934_s25 }
  0x1b   : > { %v580_v6 = vand.u32 %v578_v4, %v524_v5  ;;  %v1839_v18 = vld [vmem:[%s2108_s26 + $0x30] sm:$0xff]  ;;  %v1840_v23 = vld [vmem:[%s2108_s26 + $0x38] sm:$0xff]  ;;  %v1841_v24 = vld [vmem:[%s2108_s26 + $0x40] sm:$0xff] }
  0x1c   : > { %v802_v19 = vsel %vm800_vm2, %v747_v17, 0  ;;  %v2143_v26 = vld [vmem:[%s2475_s2] ss:$0 sm:$0xff]  ;;  %v1842_v33 = vld [vmem:[%s2108_s26 + $0x48] sm:$0xff]  ;;  %v1843_v41 = vld [vmem:[%s2108_s26 + $0x50] sm:$0xff]  ;;  %p1941_p2 = por %p1940_p1, %p1939_p0 }
  0x1d   : > { %587 = vmatpush.bf16.msra.mxu0 %v580_v6  ;;  %808 = vmatpush.bf16.msra.mxu1 %v802_v19  ;;  %v1844_v49 = vld [vmem:[%s2108_s26 + $0x58] sm:$0xff]  ;;  %v1845_v57 = vld [vmem:[%s2108_s26 + $0x60] sm:$0xff]  ;;  %v1846_v1 = vld [vmem:[%s2108_s26 + $0x68] sm:$0xff] }
  0x1e   : > { %v1857_v15 = vld [vmem:[%s2478_s5 + $0x18] sm:$0xff]  ;;  %v1856_v19 = vld [vmem:[%s2478_s5 + $0x10] sm:$0xff]  ;;  %p1942_p3 = pnand %p1941_p2, %p1937_p13 }
  0x21   : > { %588 = vmatpush.bf16.msra.mxu0 %v1850_v7  ;;  %809 = vmatpush.bf16.msra.mxu1 %v1853_v20  ;;  %v1848_v20 = vld [vmem:[%s2108_s26 + $0x78] sm:$0xff] }
  0x25   : > { %589 = vmatpush.bf16.msra.mxu0 %v1849_v8  ;;  %810 = vmatpush.bf16.msra.mxu1 %v1852_v21 }
  0x28   : > { %1705 = vmatmul.msk.bf16.vlgmr.msra.gmra.mxu0 %vm527_vm1, %v1833_v9  ;;  %v1847_v9 = vld [vmem:[%s2108_s26 + $0x70] sm:$0xff]  ;;  %s380_s26 = sand.u32 1, %s1972_s20  }
  0x29   : > { %811 = vmatpush.bf16.msra.mxu1 %v1851_v22  ;;  %v1855_v22 = vld [vmem:[%s2478_s5 + $0x8] sm:$0xff]  ;;  %s2430_s30 = sshll.u32 %s380_s26, 1  ;;  %s1552_s18 = scalar_lea.sflag [#allocation4], %s380_s26 }
  0x2a   : > { %s382_s10 = scalar_lea.vmem [#allocation3], %s2430_s30 }
  0x2b   : > { %s1564_s16 = sshll.u32 %s382_s10, 4  ;;  %s1565_s16 = int_to_ptr.vmem [resolvable:$true] %s1564_s16 }
  0x38   : > { %1706 = vmatmul.msk.bf16.gmra.mxu0 %vm527_vm1, %v1834_v10 }
  0x48   : > { %1707 = vmatmul.msk.bf16.gmra.mxu0 %vm527_vm1, %v1835_v11  ;;  %v1858_v11 = vld [vmem:[%s2478_s5 + $0x20] sm:$0xff] }
  0x49   : > { %1037 = vmatpush.bf16.msra.mxu2 %v1858_v11 }
  0x4d   : > { %1038 = vmatpush.bf16.msra.mxu2 %v1857_v15 }
  0x51   : > { %1039 = vmatpush.bf16.msra.mxu2 %v1856_v19 }
  0x55   : > { %1040 = vmatpush.bf16.msra.mxu2 %v1855_v22 }
  0x58   : > { %1708 = vmatmul.msk.bf16.gmra.mxu0 %vm527_vm1, %v1836_v12 }
  0x68   : > { %1709 = vmatmul.msk.bf16.gmra.mxu0 %vm527_vm1, %v1837_v13 }
  0x78   : > { %1710 = vmatmul.msk.bf16.gmra.mxu0 %vm527_vm1, %v1838_v14 }
  0x88   : > { %1711 = vmatmul.msk.bf16.gmra.mxu0 %vm527_vm1, %v1839_v18 }
  0x98   : > { %1712 = vmatmul.msk.bf16.gmra.mxu0 %vm527_vm1, %v1840_v23  ;;  %v1854_v23 = vld [vmem:[%s2478_s5] sm:$0xff] }
  0x99   : > { %1041 = vmatpush.bf16.msra.mxu2 %v1854_v23 }
  0xa5   : > { %v591_v25 = vpop.f32.mrf.mxu0 }
  0xa6   : > { %v592_v27 = vadd.f32 %v2143_v26, %v591_v25 }
  0xa8   : > { %1713 = vmatmul.msk.bf16.gmra.mxu0 %vm527_vm1, %v1841_v24  ;;  %v671_v30 = vmax.f32 %v592_v27, 0.0 }
  0xad   : > { %v593_v28 = vpop.f32.mrf.mxu0 }
  0xae   : > { %v594_v29 = vadd.f32 %v2143_v26, %v593_v28 }
  0xb0   : > { %v672_v31 = vmax.f32 %v594_v29, 0.0 }
  0xb2   : > { %v703_v32 = vpack.c.bf16 %v672_v31, %v671_v30 }
  0xb4   : > { %1733 = vmatmul.msk.bf16.vlgmr.msra.gmra.mxu1 %vm751_vm3, %v703_v32 }
  0xb5   : > { %v596_v34 = vpop.f32.mrf.mxu0 }
  0xb6   : > { %v597_v35 = vadd.f32 %v2143_v26, %v596_v34 }
  0xb8   : > { %1714 = vmatmul.msk.bf16.gmra.mxu0 %vm527_vm1, %v1842_v33  ;;  %v673_v38 = vmax.f32 %v597_v35, 0.0 }
  0xbd   : > { %v598_v36 = vpop.f32.mrf.mxu0 }
  0xbe   : > { %v599_v37 = vadd.f32 %v2143_v26, %v598_v36 }
  0xc0   : > { %v674_v39 = vmax.f32 %v599_v37, 0.0 }
  0xc2   : > { %v704_v40 = vpack.c.bf16 %v674_v39, %v673_v38  ;;  %v2204_v39 = vld [vmem:[%s2477_s4] ss:$0 sm:$0xff] }
  0xc4   : > { %1734 = vmatmul.msk.bf16.gmra.mxu1 %vm751_vm3, %v704_v40 }
  0xc5   : > { %v601_v42 = vpop.f32.mrf.mxu0 }
  0xc6   : > { %v602_v43 = vadd.f32 %v2143_v26, %v601_v42 }
  0xc8   : > { %1715 = vmatmul.msk.bf16.gmra.mxu0 %vm527_vm1, %v1843_v41  ;;  %v675_v46 = vmax.f32 %v602_v43, 0.0 }
  0xcd   : > { %v603_v44 = vpop.f32.mrf.mxu0 }
  0xce   : > { %v604_v45 = vadd.f32 %v2143_v26, %v603_v44 }
  0xd0   : > { %v676_v47 = vmax.f32 %v604_v45, 0.0 }
  0xd2   : > { %v705_v48 = vpack.c.bf16 %v676_v47, %v675_v46 }
  0xd4   : > { %1735 = vmatmul.msk.bf16.gmra.mxu1 %vm751_vm3, %v705_v48 }
  0xd5   : > { %v606_v50 = vpop.f32.mrf.mxu0 }
  0xd6   : > { %v607_v51 = vadd.f32 %v2143_v26, %v606_v50 }
  0xd8   : > { %1716 = vmatmul.msk.bf16.gmra.mxu0 %vm527_vm1, %v1844_v49  ;;  %v677_v54 = vmax.f32 %v607_v51, 0.0 }
  0xdd   : > { %v608_v52 = vpop.f32.mrf.mxu0 }
  0xde   : > { %v609_v53 = vadd.f32 %v2143_v26, %v608_v52 }
  0xe0   : > { %v678_v55 = vmax.f32 %v609_v53, 0.0 }
  0xe2   : > { %v706_v56 = vpack.c.bf16 %v678_v55, %v677_v54 }
  0xe4   : > { %1736 = vmatmul.msk.bf16.gmra.mxu1 %vm751_vm3, %v706_v56 }
  0xe5   : > { %v611_v58 = vpop.f32.mrf.mxu0 }
  0xe6   : > { %v612_v59 = vadd.f32 %v2143_v26, %v611_v58 }
  0xe8   : > { %1717 = vmatmul.msk.bf16.gmra.mxu0 %vm527_vm1, %v1845_v57  ;;  %v679_v62 = vmax.f32 %v612_v59, 0.0 }
  0xed   : > { %v613_v60 = vpop.f32.mrf.mxu0 }
  0xee   : > { %v614_v61 = vadd.f32 %v2143_v26, %v613_v60 }
  0xf0   : > { %v680_v63 = vmax.f32 %v614_v61, 0.0 }
  0xf2   : > { %v707_v0 = vpack.c.bf16 %v680_v63, %v679_v62 }
  0xf4   : > { %1737 = vmatmul.msk.bf16.gmra.mxu1 %vm751_vm3, %v707_v0 }
  0xf5   : > { %v616_v2 = vpop.f32.mrf.mxu0 }
  0xf6   : > { %v617_v3 = vadd.f32 %v2143_v26, %v616_v2 }
  0xf8   : > { %1718 = vmatmul.msk.bf16.gmra.mxu0 %vm527_vm1, %v1846_v1  ;;  %v681_v6 = vmax.f32 %v617_v3, 0.0 }
  0xfd   : > { %v618_v4 = vpop.f32.mrf.mxu0 }
  0xfe   : > { %v619_v5 = vadd.f32 %v2143_v26, %v618_v4 }
 0x100   : > { %v682_v7 = vmax.f32 %v619_v5, 0.0 }
 0x102   : > { %v708_v8 = vpack.c.bf16 %v682_v7, %v681_v6 }
 0x104   : > { %1738 = vmatmul.msk.bf16.gmra.mxu1 %vm751_vm3, %v708_v8 }
 0x105   : > { %v621_v10 = vpop.f32.mrf.mxu0 }
 0x106   : > { %v622_v12 = vadd.f32 %v2143_v26, %v621_v10 }
 0x108   : > { %1719 = vmatmul.msk.bf16.gmra.mxu0 %vm527_vm1, %v1847_v9  ;;  %v683_v16 = vmax.f32 %v622_v12, 0.0 }
 0x10d   : > { %v623_v13 = vpop.f32.mrf.mxu0 }
 0x10e   : > { %v624_v14 = vadd.f32 %v2143_v26, %v623_v13 }
 0x110   : > { %v684_v17 = vmax.f32 %v624_v14, 0.0 }
 0x112   : > { %v709_v18 = vpack.c.bf16 %v684_v17, %v683_v16 }
 0x114   : > { %1739 = vmatmul.msk.bf16.gmra.mxu1 %vm751_vm3, %v709_v18 }
 0x115   : > { %v626_v21 = vpop.f32.mrf.mxu0 }
 0x116   : > { %v627_v24 = vadd.f32 %v2143_v26, %v626_v21 }
 0x118   : > { %1720 = vmatmul.msk.bf16.gmra.mxu0 %vm527_vm1, %v1848_v20  ;;  %v685_v28 = vmax.f32 %v627_v24, 0.0 }
 0x11d   : > { %v628_v25 = vpop.f32.mrf.mxu0 }
 0x11e   : > { %v629_v27 = vadd.f32 %v2143_v26, %v628_v25 }
 0x120   : > { %v686_v29 = vmax.f32 %v629_v27, 0.0 }
 0x122   : > { %v710_v30 = vpack.c.bf16 %v686_v29, %v685_v28 }
 0x124   : > { %1740 = vmatmul.msk.bf16.gmra.mxu1 %vm751_vm3, %v710_v30 }
 0x125   : > { %v631_v31 = vpop.f32.mrf.mxu0 }
 0x126   : > { %v632_v32 = vadd.f32 %v2143_v26, %v631_v31 }
 0x128   : > { %v687_v35 = vmax.f32 %v632_v32, 0.0 }
 0x12d   : > { %v633_v33 = vpop.f32.mrf.mxu0 }
 0x12e   : > { %v634_v34 = vadd.f32 %v2143_v26, %v633_v33 }
 0x130   : > { %v688_v36 = vmax.f32 %v634_v34, 0.0 }
 0x131   : > { %v813_v37 = vpop.f32.mrf.mxu1 }
 0x132   : > { %v711_v38 = vpack.c.bf16 %v688_v36, %v687_v35  ;;  %v814_v41 = vadd.f32 %v2204_v39, %v813_v37 }
 0x134   : > { %1741 = vmatmul.msk.bf16.gmra.mxu1 %vm751_vm3, %v711_v38  ;;  %v893_v44 = vmax.f32 %v814_v41, 0.0 }
 0x135   : > { %v636_v40 = vpop.f32.mrf.mxu0 }
 0x136   : > { %v637_v45 = vadd.f32 %v2143_v26, %v636_v40 }
 0x138   : > { %v689_v50 = vmax.f32 %v637_v45, 0.0 }
 0x139   : > { %v815_v42 = vpop.f32.mrf.mxu1 }
 0x13a   : > { %v816_v43 = vadd.f32 %v2204_v39, %v815_v42 }
 0x13c   : > { %v894_v46 = vmax.f32 %v816_v43, 0.0 }
 0x13d   : > { %v638_v47 = vpop.f32.mrf.mxu0 }
 0x13e   : > { %v639_v48 = vadd.f32 %v2143_v26, %v638_v47  ;;  %v925_v49 = vpack.c.bf16 %v894_v46, %v893_v44 }
 0x140   : > { %v690_v51 = vmax.f32 %v639_v48, 0.0  ;;  %1769 = vmatmul.msk.bf16.vlgmr.msra.gmra.mxu2 %vm985_vm4, %v925_v49 }
 0x141   : > { %v818_v52 = vpop.f32.mrf.mxu1 }
 0x142   : > { %v712_v53 = vpack.c.bf16 %v690_v51, %v689_v50  ;;  %v819_v55 = vadd.f32 %v2204_v39, %v818_v52 }
 0x144   : > { %1742 = vmatmul.msk.bf16.gmra.mxu1 %vm751_vm3, %v712_v53  ;;  %v895_v58 = vmax.f32 %v819_v55, 0.0 }
 0x145   : > { %v641_v54 = vpop.f32.mrf.mxu0 }
 0x146   : > { %v642_v59 = vadd.f32 %v2143_v26, %v641_v54 }
 0x148   : > { %v691_v0 = vmax.f32 %v642_v59, 0.0 }
 0x149   : > { %v820_v56 = vpop.f32.mrf.mxu1 }
 0x14a   : > { %v821_v57 = vadd.f32 %v2204_v39, %v820_v56 }
 0x14c   : > { %v896_v60 = vmax.f32 %v821_v57, 0.0 }
 0x14d   : > { %v643_v61 = vpop.f32.mrf.mxu0 }
 0x14e   : > { %v644_v62 = vadd.f32 %v2143_v26, %v643_v61  ;;  %v926_v63 = vpack.c.bf16 %v896_v60, %v895_v58  ;;  %v1183_v61 = vld [vmem:[%s2480_s7 + $0x30] sm:$0xf] }
 0x150   : > { %v692_v1 = vmax.f32 %v644_v62, 0.0  ;;  %1770 = vmatmul.msk.bf16.gmra.mxu2 %vm985_vm4, %v926_v63  ;;  %v1213_v63 = vunpack.c.l.b16 %v1183_v61 }
 0x151   : > { %v823_v2 = vpop.f32.mrf.mxu1 }
 0x152   : > { %v713_v3 = vpack.c.bf16 %v692_v1, %v691_v0  ;;  %v824_v5 = vadd.f32 %v2204_v39, %v823_v2  ;;  %v1220_v0 = vpack.c.b16 %v1213_v63, %v1213_v63 }
 0x154   : > { %1743 = vmatmul.msk.bf16.gmra.mxu1 %vm751_vm3, %v713_v3  ;;  %v897_v8 = vmax.f32 %v824_v5, 0.0  ;;  %v1277_v2 = vsel %vm800_vm2, %v1220_v0, 0  ;;  %v1864_v5 = vld [vmem:[%s2480_s7 + $0x28] sm:$0xff] }
 0x155   : > { %v646_v4 = vpop.f32.mrf.mxu0  ;;  %1280 = vmatpush.bf16.msra.mxu3 %v1277_v2 }
 0x156   : > { %v647_v9 = vadd.f32 %v2143_v26, %v646_v4 }
 0x158   : > { %v693_v14 = vmax.f32 %v647_v9, 0.0 }
 0x159   : > { %v825_v6 = vpop.f32.mrf.mxu1  ;;  %1281 = vmatpush.bf16.msra.mxu3 %v1864_v5 }
 0x15a   : > { %v826_v7 = vadd.f32 %v2204_v39, %v825_v6 }
 0x15c   : > { %v898_v10 = vmax.f32 %v826_v7, 0.0 }
 0x15d   : > { %v648_v11 = vpop.f32.mrf.mxu0 }
 0x15e   : > { %v649_v12 = vadd.f32 %v2143_v26, %v648_v11  ;;  %v927_v13 = vpack.c.bf16 %v898_v10, %v897_v8  ;;  %v1863_v11 = vld [vmem:[%s2480_s7 + $0x20] sm:$0xff] }
 0x15f   : > { %1282 = vmatpush.bf16.msra.mxu3 %v1863_v11 }
 0x160   : > { %v694_v15 = vmax.f32 %v649_v12, 0.0  ;;  %1771 = vmatmul.msk.bf16.gmra.mxu2 %vm985_vm4, %v927_v13 }
 0x161   : > { %v828_v16 = vpop.f32.mrf.mxu1 }
 0x162   : > { %v714_v17 = vpack.c.bf16 %v694_v15, %v693_v14  ;;  %v829_v19 = vadd.f32 %v2204_v39, %v828_v16 }
 0x164   : > { %1744 = vmatmul.msk.bf16.gmra.mxu1 %vm751_vm3, %v714_v17  ;;  %v899_v22 = vmax.f32 %v829_v19, 0.0  ;;  %v1862_v17 = vld [vmem:[%s2480_s7 + $0x18] sm:$0xff]  ;;  %v1861_v19 = vld [vmem:[%s2480_s7 + $0x10] sm:$0xff] }
 0x165   : > { %v651_v18 = vpop.f32.mrf.mxu0  ;;  %1283 = vmatpush.bf16.msra.mxu3 %v1862_v17 }
 0x166   : > { %v652_v23 = vadd.f32 %v2143_v26, %v651_v18 }
 0x168   : > { %v695_v29 = vmax.f32 %v652_v23, 0.0 }
 0x169   : > { %v830_v20 = vpop.f32.mrf.mxu1  ;;  %1284 = vmatpush.bf16.msra.mxu3 %v1861_v19 }
 0x16a   : > { %v831_v21 = vadd.f32 %v2204_v39, %v830_v20 }
 0x16c   : > { %v900_v24 = vmax.f32 %v831_v21, 0.0  ;;  %v1860_v21 = vld [vmem:[%s2480_s7 + $0x8] sm:$0xff] }
 0x16d   : > { %v653_v25 = vpop.f32.mrf.mxu0  ;;  %1285 = vmatpush.bf16.msra.mxu3 %v1860_v21 }
 0x16e   : > { %v654_v27 = vadd.f32 %v2143_v26, %v653_v25  ;;  %v928_v28 = vpack.c.bf16 %v900_v24, %v899_v22  ;;  %v1859_v25 = vld [vmem:[%s2480_s7] sm:$0xff] }
 0x170   : > { %v696_v30 = vmax.f32 %v654_v27, 0.0  ;;  %1772 = vmatmul.msk.bf16.gmra.mxu2 %vm985_vm4, %v928_v28 }
 0x171   : > { %v833_v31 = vpop.f32.mrf.mxu1  ;;  %1286 = vmatpush.bf16.msra.mxu3 %v1859_v25 }
 0x172   : > { %v715_v32 = vpack.c.bf16 %v696_v30, %v695_v29  ;;  %v834_v34 = vadd.f32 %v2204_v39, %v833_v31 }
 0x174   : > { %1745 = vmatmul.msk.bf16.gmra.mxu1 %vm751_vm3, %v715_v32  ;;  %v901_v37 = vmax.f32 %v834_v34, 0.0 }
 0x175   : > { %v656_v33 = vpop.f32.mrf.mxu0 }
 0x176   : > { %v657_v38 = vadd.f32 %v2143_v26, %v656_v33 }
 0x178   : > { %v697_v44 = vmax.f32 %v657_v38, 0.0 }
 0x179   : > { %v835_v35 = vpop.f32.mrf.mxu1 }
 0x17a   : > { %v836_v36 = vadd.f32 %v2204_v39, %v835_v35 }
 0x17c   : > { %v902_v40 = vmax.f32 %v836_v36, 0.0 }
 0x17d   : > { %v658_v41 = vpop.f32.mrf.mxu0 }
 0x17e   : > { %v659_v42 = vadd.f32 %v2143_v26, %v658_v41  ;;  %v929_v43 = vpack.c.bf16 %v902_v40, %v901_v37  ;;  %v2280_v37 = vld [vmem:[%s2479_s6] ss:$0 sm:$0xff] }
 0x180   : > { %v698_v45 = vmax.f32 %v659_v42, 0.0  ;;  %1773 = vmatmul.msk.bf16.gmra.mxu2 %vm985_vm4, %v929_v43 }
 0x181   : > { %v838_v46 = vpop.f32.mrf.mxu1 }
 0x182   : > { %v716_v47 = vpack.c.bf16 %v698_v45, %v697_v44  ;;  %v839_v49 = vadd.f32 %v2204_v39, %v838_v46 }
 0x184   : > { %1746 = vmatmul.msk.bf16.gmra.mxu1 %vm751_vm3, %v716_v47  ;;  %v903_v52 = vmax.f32 %v839_v49, 0.0 }
 0x185   : > { %v661_v48 = vpop.f32.mrf.mxu0 }
 0x186   : > { %v662_v53 = vadd.f32 %v2143_v26, %v661_v48 }
 0x188   : > { %v699_v58 = vmax.f32 %v662_v53, 0.0 }
 0x189   : > { %v840_v50 = vpop.f32.mrf.mxu1 }
 0x18a   : > { %v841_v51 = vadd.f32 %v2204_v39, %v840_v50 }
 0x18c   : > { %v904_v54 = vmax.f32 %v841_v51, 0.0 }
 0x18d   : > { %v663_v55 = vpop.f32.mrf.mxu0 }
 0x18e   : > { %v930_v56 = vpack.c.bf16 %v904_v54, %v903_v52  ;;  %v664_v57 = vadd.f32 %v2143_v26, %v663_v55 }
 0x190   : > { %v700_v59 = vmax.f32 %v664_v57, 0.0  ;;  %1774 = vmatmul.msk.bf16.gmra.mxu2 %vm985_vm4, %v930_v56 }
 0x191   : > { %v843_v60 = vpop.f32.mrf.mxu1 }
 0x192   : > { %v717_v62 = vpack.c.bf16 %v700_v59, %v699_v58  ;;  %v844_v3 = vadd.f32 %v2204_v39, %v843_v60 }
 0x194   : > { %1747 = vmatmul.msk.bf16.gmra.mxu1 %vm751_vm3, %v717_v62  ;;  %v905_v7 = vmax.f32 %v844_v3, 0.0 }
 0x195   : > { %v666_v1 = vpop.f32.mrf.mxu0 }
 0x196   : > { %v667_v8 = vadd.f32 %v2143_v26, %v666_v1 }
 0x198   : > { %v701_v14 = vmax.f32 %v667_v8, 0.0 }
 0x199   : > { %v845_v4 = vpop.f32.mrf.mxu1 }
 0x19a   : > { %v846_v6 = vadd.f32 %v2204_v39, %v845_v4 }
 0x19c   : > { %v906_v9 = vmax.f32 %v846_v6, 0.0 }
 0x19d   : > { %v668_v10 = vpop.f32.mrf.mxu0 }
 0x19e   : > { %v931_v12 = vpack.c.bf16 %v906_v9, %v905_v7  ;;  %v669_v13 = vadd.f32 %v2143_v26, %v668_v10 }
 0x1a0   : > { %v702_v15 = vmax.f32 %v669_v13, 0.0  ;;  %1775 = vmatmul.msk.bf16.gmra.mxu2 %vm985_vm4, %v931_v12 }
 0x1a1   : > { %v848_v16 = vpop.f32.mrf.mxu1 }
 0x1a2   : > { %v718_v18 = vpack.c.bf16 %v702_v15, %v701_v14  ;;  %v849_v26 = vadd.f32 %v2204_v39, %v848_v16 }
 0x1a4   : > { %1748 = vmatmul.msk.bf16.gmra.mxu1 %vm751_vm3, %v718_v18  ;;  %v907_v23 = vmax.f32 %v849_v26, 0.0 }
 0x1a9   : > { %v850_v20 = vpop.f32.mrf.mxu1 }
 0x1aa   : > { %v851_v22 = vadd.f32 %v2204_v39, %v850_v20 }
 0x1ac   : > { %v908_v24 = vmax.f32 %v851_v22, 0.0 }
 0x1ae   : > { %v932_v27 = vpack.c.bf16 %v908_v24, %v907_v23 }
 0x1b0   : > { %1776 = vmatmul.msk.bf16.gmra.mxu2 %vm985_vm4, %v932_v27 }
 0x1b1   : > { %v853_v28 = vpop.f32.mrf.mxu1 }
 0x1b2   : > { %v854_v29 = vadd.f32 %v2204_v39, %v853_v28 }
 0x1b4   : > { %v909_v32 = vmax.f32 %v854_v29, 0.0 }
 0x1b9   : > { %v855_v30 = vpop.f32.mrf.mxu1 }
 0x1ba   : > { %v856_v31 = vadd.f32 %v2204_v39, %v855_v30 }
 0x1bc   : > { %v910_v33 = vmax.f32 %v856_v31, 0.0 }
 0x1be   : > { %v933_v34 = vpack.c.bf16 %v910_v33, %v909_v32 }
 0x1c0   : > { %1777 = vmatmul.msk.bf16.gmra.mxu2 %vm985_vm4, %v933_v34 }
 0x1c1   : > { %v858_v35 = vpop.f32.mrf.mxu1 }
 0x1c2   : > { %v859_v38 = vadd.f32 %v2204_v39, %v858_v35 }
 0x1c3   : > { %v1043_v36 = vpop.f32.mrf.mxu2 }
 0x1c4   : > { %v1044_v41 = vadd.f32 %v2280_v37, %v1043_v36  ;;  %v911_v44 = vmax.f32 %v859_v38, 0.0 }
 0x1c6   : > { %v1123_v47 = vmax.f32 %v1044_v41, 0.0 }
 0x1c9   : > { %v860_v40 = vpop.f32.mrf.mxu1 }
 0x1ca   : > { %v861_v42 = vadd.f32 %v2204_v39, %v860_v40 }
 0x1cb   : > { %v1045_v43 = vpop.f32.mrf.mxu2 }
 0x1cc   : > { %v912_v45 = vmax.f32 %v861_v42, 0.0  ;;  %v1046_v46 = vadd.f32 %v2280_v37, %v1045_v43 }
 0x1ce   : > { %v934_v48 = vpack.c.bf16 %v912_v45, %v911_v44  ;;  %v1124_v49 = vmax.f32 %v1046_v46, 0.0 }
 0x1d0   : > { %1778 = vmatmul.msk.bf16.gmra.mxu2 %vm985_vm4, %v934_v48  ;;  %v1155_v50 = vpack.c.bf16 %v1124_v49, %v1123_v47 }
 0x1d1   : > { %v863_v51 = vpop.f32.mrf.mxu1 }
 0x1d2   : > { %1809 = vmatmul.msk.bf16.vlgmr.msra.gmra.mxu3 %vm1227_vm5, %v1155_v50  ;;  %v864_v53 = vadd.f32 %v2204_v39, %v863_v51 }
 0x1d3   : > { %v1048_v52 = vpop.f32.mrf.mxu2 }
 0x1d4   : > { %v1049_v55 = vadd.f32 %v2280_v37, %v1048_v52  ;;  %v913_v58 = vmax.f32 %v864_v53, 0.0 }
 0x1d6   : > { %v1125_v61 = vmax.f32 %v1049_v55, 0.0 }
 0x1d9   : > { %v865_v54 = vpop.f32.mrf.mxu1 }
 0x1da   : > { %v866_v56 = vadd.f32 %v2204_v39, %v865_v54 }
 0x1db   : > { %v1050_v57 = vpop.f32.mrf.mxu2 }
 0x1dc   : > { %v914_v59 = vmax.f32 %v866_v56, 0.0  ;;  %v1051_v60 = vadd.f32 %v2280_v37, %v1050_v57 }
 0x1de   : > { %v935_v62 = vpack.c.bf16 %v914_v59, %v913_v58  ;;  %v1126_v63 = vmax.f32 %v1051_v60, 0.0 }
 0x1e0   : > { %1779 = vmatmul.msk.bf16.gmra.mxu2 %vm985_vm4, %v935_v62  ;;  %v1156_v0 = vpack.c.bf16 %v1126_v63, %v1125_v61 }
 0x1e1   : > { %v868_v1 = vpop.f32.mrf.mxu1 }
 0x1e2   : > { %1810 = vmatmul.msk.bf16.gmra.mxu3 %vm1227_vm5, %v1156_v0  ;;  %v869_v3 = vadd.f32 %v2204_v39, %v868_v1 }
 0x1e3   : > { %v1053_v2 = vpop.f32.mrf.mxu2 }
 0x1e4   : > { %v1054_v5 = vadd.f32 %v2280_v37, %v1053_v2  ;;  %v915_v8 = vmax.f32 %v869_v3, 0.0 }
 0x1e6   : > { %v1127_v11 = vmax.f32 %v1054_v5, 0.0 }
 0x1e9   : > { %v870_v4 = vpop.f32.mrf.mxu1 }
 0x1ea   : > { %v871_v6 = vadd.f32 %v2204_v39, %v870_v4 }
 0x1eb   : > { %v1055_v7 = vpop.f32.mrf.mxu2 }
 0x1ec   : > { %v916_v9 = vmax.f32 %v871_v6, 0.0  ;;  %v1056_v10 = vadd.f32 %v2280_v37, %v1055_v7 }
 0x1ee   : > { %v936_v12 = vpack.c.bf16 %v916_v9, %v915_v8  ;;  %v1128_v13 = vmax.f32 %v1056_v10, 0.0 }
 0x1f0   : > { %1780 = vmatmul.msk.bf16.gmra.mxu2 %vm985_vm4, %v936_v12  ;;  %v1157_v14 = vpack.c.bf16 %v1128_v13, %v1127_v11 }
 0x1f1   : > { %v873_v15 = vpop.f32.mrf.mxu1 }
 0x1f2   : > { %1811 = vmatmul.msk.bf16.gmra.mxu3 %vm1227_vm5, %v1157_v14  ;;  %v874_v17 = vadd.f32 %v2204_v39, %v873_v15 }
 0x1f3   : > { %v1058_v16 = vpop.f32.mrf.mxu2 }
 0x1f4   : > { %v1059_v19 = vadd.f32 %v2280_v37, %v1058_v16  ;;  %v917_v21 = vmax.f32 %v874_v17, 0.0 }
 0x1f6   : > { %v1129_v24 = vmax.f32 %v1059_v19, 0.0 }
 0x1f9   : > { %v875_v18 = vpop.f32.mrf.mxu1 }
 0x1fa   : > { %v876_v26 = vadd.f32 %v2204_v39, %v875_v18 }
 0x1fb   : > { %v1060_v20 = vpop.f32.mrf.mxu2 }
 0x1fc   : > { %v918_v22 = vmax.f32 %v876_v26, 0.0  ;;  %v1061_v23 = vadd.f32 %v2280_v37, %v1060_v20 }
 0x1fe   : > { %v937_v25 = vpack.c.bf16 %v918_v22, %v917_v21  ;;  %v1130_v27 = vmax.f32 %v1061_v23, 0.0  ;;  %v2333_v23 = vld [vmem:[%s2481_s8] ss:$0 sm:$0xff] }
 0x200   : > { %1781 = vmatmul.msk.bf16.gmra.mxu2 %vm985_vm4, %v937_v25  ;;  %v1158_v28 = vpack.c.bf16 %v1130_v27, %v1129_v24 }
 0x201   : > { %v878_v29 = vpop.f32.mrf.mxu1 }
 0x202   : > { %1812 = vmatmul.msk.bf16.gmra.mxu3 %vm1227_vm5, %v1158_v28  ;;  %v879_v31 = vadd.f32 %v2204_v39, %v878_v29 }
 0x203   : > { %v1063_v30 = vpop.f32.mrf.mxu2 }
 0x204   : > { %v1064_v33 = vadd.f32 %v2280_v37, %v1063_v30  ;;  %v919_v36 = vmax.f32 %v879_v31, 0.0 }
 0x206   : > { %v1131_v41 = vmax.f32 %v1064_v33, 0.0 }
 0x209   : > { %v880_v32 = vpop.f32.mrf.mxu1 }
 0x20a   : > { %v881_v34 = vadd.f32 %v2204_v39, %v880_v32 }
 0x20b   : > { %v1065_v35 = vpop.f32.mrf.mxu2 }
 0x20c   : > { %v920_v38 = vmax.f32 %v881_v34, 0.0  ;;  %v1066_v40 = vadd.f32 %v2280_v37, %v1065_v35 }
 0x20e   : > { %v938_v42 = vpack.c.bf16 %v920_v38, %v919_v36  ;;  %v1132_v43 = vmax.f32 %v1066_v40, 0.0 }
 0x210   : > { %v1159_v44 = vpack.c.bf16 %v1132_v43, %v1131_v41  ;;  %1782 = vmatmul.msk.bf16.gmra.mxu2 %vm985_vm4, %v938_v42 }
 0x211   : > { %v883_v45 = vpop.f32.mrf.mxu1 }
 0x212   : > { %1813 = vmatmul.msk.bf16.gmra.mxu3 %vm1227_vm5, %v1159_v44  ;;  %v884_v47 = vadd.f32 %v2204_v39, %v883_v45 }
 0x213   : > { %v1068_v46 = vpop.f32.mrf.mxu2 }
 0x214   : > { %v1069_v49 = vadd.f32 %v2280_v37, %v1068_v46  ;;  %v921_v52 = vmax.f32 %v884_v47, 0.0 }
 0x216   : > { %v1133_v55 = vmax.f32 %v1069_v49, 0.0 }
 0x219   : > { %v885_v48 = vpop.f32.mrf.mxu1 }
 0x21a   : > { %v886_v50 = vadd.f32 %v2204_v39, %v885_v48 }
 0x21b   : > { %v1070_v51 = vpop.f32.mrf.mxu2 }
 0x21c   : > { %v922_v53 = vmax.f32 %v886_v50, 0.0  ;;  %v1071_v54 = vadd.f32 %v2280_v37, %v1070_v51 }
 0x21e   : > { %v939_v56 = vpack.c.bf16 %v922_v53, %v921_v52  ;;  %v1134_v57 = vmax.f32 %v1071_v54, 0.0 }
 0x220   : > { %v1160_v58 = vpack.c.bf16 %v1134_v57, %v1133_v55  ;;  %1783 = vmatmul.msk.bf16.gmra.mxu2 %vm985_vm4, %v939_v56 }
 0x221   : > { %v888_v59 = vpop.f32.mrf.mxu1 }
 0x222   : > { %1814 = vmatmul.msk.bf16.gmra.mxu3 %vm1227_vm5, %v1160_v58  ;;  %v889_v61 = vadd.f32 %v2204_v39, %v888_v59 }
 0x223   : > { %v1073_v60 = vpop.f32.mrf.mxu2 }
 0x224   : > { %v1074_v63 = vadd.f32 %v2280_v37, %v1073_v60  ;;  %v923_v2 = vmax.f32 %v889_v61, 0.0 }
 0x226   : > { %v1135_v5 = vmax.f32 %v1074_v63, 0.0 }
 0x229   : > { %v890_v62 = vpop.f32.mrf.mxu1 }
 0x22a   : > { %v891_v0 = vadd.f32 %v2204_v39, %v890_v62 }
 0x22b   : > { %v1075_v1 = vpop.f32.mrf.mxu2 }
 0x22c   : > { %v924_v3 = vmax.f32 %v891_v0, 0.0  ;;  %v1076_v4 = vadd.f32 %v2280_v37, %v1075_v1 }
 0x22e   : > { %v940_v6 = vpack.c.bf16 %v924_v3, %v923_v2  ;;  %v1136_v7 = vmax.f32 %v1076_v4, 0.0 }
 0x230   : > { %v1161_v8 = vpack.c.bf16 %v1136_v7, %v1135_v5  ;;  %1784 = vmatmul.msk.bf16.gmra.mxu2 %vm985_vm4, %v940_v6 }
 0x232   : > { %1815 = vmatmul.msk.bf16.gmra.mxu3 %vm1227_vm5, %v1161_v8 }
 0x233   : > { %v1078_v9 = vpop.f32.mrf.mxu2 }
 0x234   : > { %v1079_v10 = vadd.f32 %v2280_v37, %v1078_v9 }
 0x236   : > { %v1137_v39 = vmax.f32 %v1079_v10, 0.0 }
 0x23b   : > { %v1080_v11 = vpop.f32.mrf.mxu2 }
 0x23c   : > { %v1081_v12 = vadd.f32 %v2280_v37, %v1080_v11 }
 0x23e   : > { %v1138_v13 = vmax.f32 %v1081_v12, 0.0 }
 0x240   : > { %v1162_v14 = vpack.c.bf16 %v1138_v13, %v1137_v39 }
 0x242   : > { %1816 = vmatmul.msk.bf16.gmra.mxu3 %vm1227_vm5, %v1162_v14 }
 0x243   : > { %v1083_v15 = vpop.f32.mrf.mxu2 }
 0x244   : > { %v1084_v16 = vadd.f32 %v2280_v37, %v1083_v15 }
 0x246   : > { %v1139_v19 = vmax.f32 %v1084_v16, 0.0 }
 0x24b   : > { %v1085_v17 = vpop.f32.mrf.mxu2 }
 0x24c   : > { %v1086_v18 = vadd.f32 %v2280_v37, %v1085_v17 }
 0x24e   : > { %v1140_v26 = vmax.f32 %v1086_v18, 0.0 }
 0x250   : > { %v1163_v20 = vpack.c.bf16 %v1140_v26, %v1139_v19 }
 0x252   : > { %1817 = vmatmul.msk.bf16.gmra.mxu3 %vm1227_vm5, %v1163_v20 }
 0x253   : > { %v1088_v21 = vpop.f32.mrf.mxu2 }
 0x254   : > { %v1089_v24 = vadd.f32 %v2280_v37, %v1088_v21 }
 0x255   : > { %v1288_v22 = vpop.f32.mrf.mxu3 }
 0x256   : > { %v1289_v27 = vadd.f32 %v2333_v23, %v1288_v22  ;;  %v1141_v30 = vmax.f32 %v1089_v24, 0.0 }
 0x258   : > { %v1368_v33 = vmax.f32 %v1289_v27, 0.0 }
 0x25b   : > { %v1090_v25 = vpop.f32.mrf.mxu2 }
 0x25c   : > { %v1091_v28 = vadd.f32 %v2280_v37, %v1090_v25 }
 0x25d   : > { %v1290_v29 = vpop.f32.mrf.mxu3 }
 0x25e   : > { %v1142_v31 = vmax.f32 %v1091_v28, 0.0  ;;  %v1291_v32 = vadd.f32 %v2333_v23, %v1290_v29 }
 0x260   : > { %v1164_v34 = vpack.c.bf16 %v1142_v31, %v1141_v30  ;;  %v1369_v35 = vmax.f32 %v1291_v32, 0.0 }
 0x262   : > { %1818 = vmatmul.msk.bf16.gmra.mxu3 %vm1227_vm5, %v1164_v34  ;;  %v2340_v36 = vpack.c.bf16 %v1369_v35, %v1368_v33 }
 0x263   : > { %v1093_v38 = vpop.f32.mrf.mxu2 }
 0x264   : > { %v1094_v41 = vadd.f32 %v2280_v37, %v1093_v38 }
 0x265   : > { %v1293_v40 = vpop.f32.mrf.mxu3 }
 0x266   : > { %v1294_v43 = vadd.f32 %v2333_v23, %v1293_v40  ;;  %v1143_v46 = vmax.f32 %v1094_v41, 0.0 }
 0x268   : > { %v1370_v49 = vmax.f32 %v1294_v43, 0.0 }
 0x26b   : > { %v1095_v42 = vpop.f32.mrf.mxu2 }
 0x26c   : > { %v1096_v44 = vadd.f32 %v2280_v37, %v1095_v42 }
 0x26d   : > { %v1295_v45 = vpop.f32.mrf.mxu3 }
 0x26e   : > { %v1144_v47 = vmax.f32 %v1096_v44, 0.0  ;;  %v1296_v48 = vadd.f32 %v2333_v23, %v1295_v45 }
 0x270   : > { %v1165_v50 = vpack.c.bf16 %v1144_v47, %v1143_v46  ;;  %v1371_v51 = vmax.f32 %v1296_v48, 0.0 }
 0x272   : > { %1819 = vmatmul.msk.bf16.gmra.mxu3 %vm1227_vm5, %v1165_v50  ;;  %v2347_v52 = vpack.c.bf16 %v1371_v51, %v1370_v49 }
 0x273   : > { %v1098_v53 = vpop.f32.mrf.mxu2 }
 0x274   : > { %v1099_v55 = vadd.f32 %v2280_v37, %v1098_v53 }
 0x275   : > { %v1298_v54 = vpop.f32.mrf.mxu3 }
 0x276   : > { %v1299_v57 = vadd.f32 %v2333_v23, %v1298_v54  ;;  %v1145_v60 = vmax.f32 %v1099_v55, 0.0 }
 0x278   : > { %v1372_v63 = vmax.f32 %v1299_v57, 0.0 }
 0x27b   : > { %v1100_v56 = vpop.f32.mrf.mxu2 }
 0x27c   : > { %v1101_v58 = vadd.f32 %v2280_v37, %v1100_v56 }
 0x27d   : > { %v1300_v59 = vpop.f32.mrf.mxu3 }
 0x27e   : > { %v1146_v61 = vmax.f32 %v1101_v58, 0.0  ;;  %v1301_v62 = vadd.f32 %v2333_v23, %v1300_v59 }
 0x280   : > { %v1166_v0 = vpack.c.bf16 %v1146_v61, %v1145_v60  ;;  %v1373_v1 = vmax.f32 %v1301_v62, 0.0 }
 0x282   : > { %1820 = vmatmul.msk.bf16.gmra.mxu3 %vm1227_vm5, %v1166_v0  ;;  %v2354_v2 = vpack.c.bf16 %v1373_v1, %v1372_v63 }
 0x283   : > { %v1103_v3 = vpop.f32.mrf.mxu2 }
 0x284   : > { %v1104_v5 = vadd.f32 %v2280_v37, %v1103_v3 }
 0x285   : > { %v1303_v4 = vpop.f32.mrf.mxu3 }
 0x286   : > { %v1304_v7 = vadd.f32 %v2333_v23, %v1303_v4  ;;  %v1147_v10 = vmax.f32 %v1104_v5, 0.0 }
 0x288   : > { %v1374_v39 = vmax.f32 %v1304_v7, 0.0 }
 0x28b   : > { %v1105_v6 = vpop.f32.mrf.mxu2 }
 0x28c   : > { %v1106_v8 = vadd.f32 %v2280_v37, %v1105_v6 }
 0x28d   : > { %v1305_v9 = vpop.f32.mrf.mxu3 }
 0x28e   : > { %v1148_v11 = vmax.f32 %v1106_v8, 0.0  ;;  %v1306_v12 = vadd.f32 %v2333_v23, %v1305_v9 }
 0x290   : > { %v1167_v13 = vpack.c.bf16 %v1148_v11, %v1147_v10  ;;  %v1375_v14 = vmax.f32 %v1306_v12, 0.0 }
 0x292   : > { %1821 = vmatmul.msk.bf16.gmra.mxu3 %vm1227_vm5, %v1167_v13  ;;  %v2361_v15 = vpack.c.bf16 %v1375_v14, %v1374_v39 }
 0x293   : > { %v1108_v16 = vpop.f32.mrf.mxu2 }
 0x294   : > { %v1109_v18 = vadd.f32 %v2280_v37, %v1108_v16 }
 0x295   : > { %v1308_v17 = vpop.f32.mrf.mxu3 }
 0x296   : > { %v1309_v26 = vadd.f32 %v2333_v23, %v1308_v17  ;;  %v1149_v22 = vmax.f32 %v1109_v18, 0.0 }
 0x298   : > { %v1376_v27 = vmax.f32 %v1309_v26, 0.0 }
 0x29b   : > { %v1110_v19 = vpop.f32.mrf.mxu2 }
 0x29c   : > { %v1111_v20 = vadd.f32 %v2280_v37, %v1110_v19 }
 0x29d   : > { %v1310_v21 = vpop.f32.mrf.mxu3 }
 0x29e   : > { %v1150_v24 = vmax.f32 %v1111_v20, 0.0  ;;  %v1311_v25 = vadd.f32 %v2333_v23, %v1310_v21 }
 0x2a0   : > { %v1168_v28 = vpack.c.bf16 %v1150_v24, %v1149_v22  ;;  %v1377_v29 = vmax.f32 %v1311_v25, 0.0  ;;  %v1430_v24 = vsel %vm751_vm3, %v2361_v15, 0 }
 0x2a2   : > { %1822 = vmatmul.msk.bf16.gmra.mxu3 %vm1227_vm5, %v1168_v28  ;;  %v1405_v30 = vpack.c.bf16 %v1377_v29, %v1376_v27  ;;  %v1427_v28 = vsel %vm751_vm3, %v2354_v2, 0 }
 0x2a3   : > { %v1113_v31 = vpop.f32.mrf.mxu2 }
 0x2a4   : > { %v1114_v33 = vadd.f32 %v2280_v37, %v1113_v31  ;;  %v1433_v18 = vsel %vm751_vm3, %v1405_v30, 0 }
 0x2a5   : > { %v1313_v32 = vpop.f32.mrf.mxu3 }
 0x2a6   : > { %v1151_v40 = vmax.f32 %v1114_v33, 0.0  ;;  %v1314_v4 = vadd.f32 %v2333_v23, %v1313_v32 }
 0x2a8   : > { %v1378_v9 = vmax.f32 %v1314_v4, 0.0 }
 0x2ab   : > { %v1115_v34 = vpop.f32.mrf.mxu2 }
 0x2ac   : > { %v1116_v35 = vadd.f32 %v2280_v37, %v1115_v34  ;;  %v1424_v34 = vsel %vm751_vm3, %v2347_v52, 0 }
 0x2ad   : > { %v1315_v38 = vpop.f32.mrf.mxu3 }
 0x2ae   : > { %v1152_v41 = vmax.f32 %v1116_v35, 0.0  ;;  %v1316_v1 = vadd.f32 %v2333_v23, %v1315_v38  ;;  %v1421_v38 = vsel %vm751_vm3, %v2340_v36, 0 }
 0x2b0   : > { %v1169_v42 = vpack.c.bf16 %v1152_v41, %v1151_v40  ;;  %v1379_v5 = vmax.f32 %v1316_v1, 0.0 }
 0x2b2   : > { %1823 = vmatmul.msk.bf16.gmra.mxu3 %vm1227_vm5, %v1169_v42  ;;  %v1406_v39 = vpack.c.bf16 %v1379_v5, %v1378_v9 }
 0x2b3   : > { %v1118_v43 = vpop.f32.mrf.mxu2 }
 0x2b4   : > { %v1119_v45 = vadd.f32 %v2280_v37, %v1118_v43  ;;  %v1436_v14 = vsel %vm751_vm3, %v1406_v39, 0 }
 0x2b5   : > { %v1318_v44 = vpop.f32.mrf.mxu3 }
 0x2b6   : > { %v1153_v49 = vmax.f32 %v1119_v45, 0.0  ;;  %v1319_v60 = vadd.f32 %v2333_v23, %v1318_v44 }
 0x2b8   : > { %v1380_v0 = vmax.f32 %v1319_v60, 0.0 }
 0x2bb   : > { %v1120_v46 = vpop.f32.mrf.mxu2 }
 0x2bc   : > { %v1121_v47 = vadd.f32 %v2280_v37, %v1120_v46 }
 0x2bd   : > { %v1320_v48 = vpop.f32.mrf.mxu3 }
 0x2be   : > { %v1154_v50 = vmax.f32 %v1121_v47, 0.0  ;;  %v1321_v57 = vadd.f32 %v2333_v23, %v1320_v48 }
 0x2c0   : > { %v1170_v51 = vpack.c.bf16 %v1154_v50, %v1153_v49  ;;  %v1381_v37 = vmax.f32 %v1321_v57, 0.0 }
 0x2c2   : > { %1824 = vmatmul.msk.bf16.gmra.mxu3 %vm1227_vm5, %v1170_v51  ;;  %v1407_v3 = vpack.c.bf16 %v1381_v37, %v1380_v0 }
 0x2c4   : > { %v1439_v7 = vsel %vm751_vm3, %v1407_v3, 0 }
 0x2c5   : > { %v1323_v53 = vpop.f32.mrf.mxu3 }
 0x2c6   : > { %v1324_v54 = vadd.f32 %v2333_v23, %v1323_v53 }
 0x2c8   : > { %v1382_v58 = vmax.f32 %v1324_v54, 0.0 }
 0x2cd   : > { %v1325_v55 = vpop.f32.mrf.mxu3 }
 0x2ce   : > { %v1326_v56 = vadd.f32 %v2333_v23, %v1325_v55 }
 0x2d0   : > { %v1383_v59 = vmax.f32 %v1326_v56, 0.0 }
 0x2d2   : > { %v1408_v61 = vpack.c.bf16 %v1383_v59, %v1382_v58 }
 0x2d4   : > { %v1442_v62 = vsel %vm751_vm3, %v1408_v61, 0 }
 0x2d5   : > { %v1328_v63 = vpop.f32.mrf.mxu3  ;;  %1468 = vmatpush.bf16.xpose.msrb.mxu0 %v1442_v62 }
 0x2d6   : > { %v1329_v6 = vadd.f32 %v2333_v23, %v1328_v63 }
 0x2d8   : > { %v1384_v11 = vmax.f32 %v1329_v6, 0.0 }
 0x2dd   : > { %v1330_v8 = vpop.f32.mrf.mxu3  ;;  %1469 = vmatpush.bf16.xpose.msrb.mxu0 %v1439_v7 }
 0x2de   : > { %v1331_v10 = vadd.f32 %v2333_v23, %v1330_v8 }
 0x2e0   : > { %v1385_v12 = vmax.f32 %v1331_v10, 0.0  ;;  %v1400_v10 = vld [vmem:[%s2482_s9] sm:$0xf] }
 0x2e2   : > { %v2384_v13 = vpack.c.bf16 %v1385_v12, %v1384_v11  ;;  %v1494_v12 = vld [vmem:[#allocation2] sm:$0x1] }
 0x2e3   : > { %1497 = vperm.xlu0 %1905, %v1494_v12  }
 0x2e5   : > { %v1333_v16 = vpop.f32.mrf.mxu3  ;;  %1470 = vmatpush.bf16.xpose.msrb.mxu0 %v1436_v14 }
 0x2e6   : > { %v1334_v17 = vadd.f32 %v2333_v23, %v1333_v16  ;;  %v1445_v16 = vsel %vm751_vm3, %v2384_v13, 0 }
 0x2e8   : > { %v1386_v20 = vmax.f32 %v1334_v17, 0.0 }
 0x2ed   : > { %v1335_v19 = vpop.f32.mrf.mxu3  ;;  %1471 = vmatpush.bf16.xpose.msrb.mxu0 %v1433_v18 }
 0x2ee   : > { %v1336_v26 = vadd.f32 %v2333_v23, %v1335_v19 }
 0x2f0   : > { %v1387_v21 = vmax.f32 %v1336_v26, 0.0 }
 0x2f2   : > { %v2390_v22 = vpack.c.bf16 %v1387_v21, %v1386_v20 }
 0x2f4   : > { %v1448_v14 = vsel %vm751_vm3, %v2390_v22, 0 }
 0x2f5   : > { %v1338_v25 = vpop.f32.mrf.mxu3  ;;  %1472 = vmatpush.bf16.xpose.msrb.mxu0 %v1430_v24 }
 0x2f6   : > { %v1339_v27 = vadd.f32 %v2333_v23, %v1338_v25 }
 0x2f8   : > { %v1388_v31 = vmax.f32 %v1339_v27, 0.0 }
 0x2fd   : > { %v1340_v29 = vpop.f32.mrf.mxu3  ;;  %1473 = vmatpush.bf16.xpose.msrb.mxu0 %v1427_v28 }
 0x2fe   : > { %v1341_v30 = vadd.f32 %v2333_v23, %v1340_v29 }
 0x300   : > { %v1389_v32 = vmax.f32 %v1341_v30, 0.0 }
 0x302   : > { %v1411_v33 = vpack.c.bf16 %v1389_v32, %v1388_v31 }
 0x304   : > { %v1451_v39 = vsel %vm751_vm3, %v1411_v33, 0 }
 0x305   : > { %v1343_v35 = vpop.f32.mrf.mxu3  ;;  %1474 = vmatpush.bf16.xpose.msrb.mxu0 %v1424_v34 }
 0x306   : > { %v1344_v15 = vadd.f32 %v2333_v23, %v1343_v35 }
 0x308   : > { %v1390_v41 = vmax.f32 %v1344_v15, 0.0 }
 0x30d   : > { %v1345_v40 = vpop.f32.mrf.mxu3  ;;  %1475 = vmatpush.bf16.xpose.msrb.mxu0 %v1421_v38 }
 0x30e   : > { %v1346_v2 = vadd.f32 %v2333_v23, %v1345_v40 }
 0x310   : > { %v1391_v42 = vmax.f32 %v1346_v2, 0.0 }
 0x312   : > { %v1412_v43 = vpack.c.bf16 %v1391_v42, %v1390_v41 }
 0x314   : > { %1825 = vmatmul.msk.bf16.vlgmr.msrb.gmra.mxu0 %vm751_vm3, %v1400_v10 }
 0x315   : > { %v1348_v44 = vpop.f32.mrf.mxu3 }
 0x316   : > { %v1349_v45 = vadd.f32 %v2333_v23, %v1348_v44 }
 0x318   : > { %v1392_v47 = vmax.f32 %v1349_v45, 0.0 }
 0x31d   : > { %v1350_v46 = vpop.f32.mrf.mxu3 }
 0x31e   : > { %v1351_v52 = vadd.f32 %v2333_v23, %v1350_v46 }
 0x320   : > { %v1393_v48 = vmax.f32 %v1351_v52, 0.0  ;;  %v1546_v52 = vlaneseq }
 0x322   : > { %v1413_v49 = vpack.c.bf16 %v1393_v48, %v1392_v47  ;;  %vm1548_vm14 = vcmp.lt.s32.totalorder %v1546_v52, 256 }
 0x324   : > { %v1457_v11 = vsel %vm751_vm3, %v1413_v49, 0 }
 0x325   : > { %v1353_v50 = vpop.f32.mrf.mxu3 }
 0x326   : > { %v1354_v4 = vadd.f32 %v2333_v23, %v1353_v50 }
 0x328   : > { %v1394_v7 = vmax.f32 %v1354_v4, 0.0 }
 0x32d   : > { %v1355_v51 = vpop.f32.mrf.mxu3 }
 0x32e   : > { %v1356_v1 = vadd.f32 %v2333_v23, %v1355_v51 }
 0x330   : > { %v1395_v5 = vmax.f32 %v1356_v1, 0.0 }
 0x332   : > { %v1414_v8 = vpack.c.bf16 %v1395_v5, %v1394_v7 }
 0x334   : > { %v1460_v9 = vsel %vm751_vm3, %v1414_v8, 0 }
 0x335   : > { %v1358_v53 = vpop.f32.mrf.mxu3 }
 0x336   : > { %v1359_v61 = vadd.f32 %v2333_v23, %v1358_v53 }
 0x338   : > { %v1396_v0 = vmax.f32 %v1359_v61, 0.0 }
 0x33d   : > { %v1360_v36 = vpop.f32.mrf.mxu3 }
 0x33e   : > { %v1361_v58 = vadd.f32 %v2333_v23, %v1360_v36 }
 0x340   : > { %v1397_v62 = vmax.f32 %v1361_v58, 0.0 }
 0x342   : > { %v1415_v3 = vpack.c.bf16 %v1397_v62, %v1396_v0 }
 0x344   : > { %v1463_v6 = vsel %vm751_vm3, %v1415_v3, 0 }
 0x345   : > { %v1363_v54 = vpop.f32.mrf.mxu3 }
 0x346   : > { %v1364_v55 = vadd.f32 %v2333_v23, %v1363_v54 }
 0x348   : > { %v1398_v59 = vmax.f32 %v1364_v55, 0.0 }
 0x34d   : > { %v1365_v56 = vpop.f32.mrf.mxu3 }
 0x34e   : > { %v1366_v57 = vadd.f32 %v2333_v23, %v1365_v56  ;;  %v1454_v23 = vsel %vm751_vm3, %v1412_v43, 0 }
 0x350   : > { %v1399_v60 = vmax.f32 %v1366_v57, 0.0 }
 0x352   : > { %v1416_v37 = vpack.c.bf16 %v1399_v60, %v1398_v59 }
 0x354   : > { %v1466_v63 = vsel %vm751_vm3, %v1416_v37, 0 }
 0x355   : > { %1481 = vmatpush.bf16.xpose.msrb.mxu1 %v1466_v63  ;;  %v1498_v19 = vpop.permute.xlu0 %1497 }
 0x356   : > { %v1500_v26 = vperm.slane %v1498_v19, 0 }
 0x35d   : > { %1482 = vmatpush.bf16.xpose.msrb.mxu1 %v1463_v6 }
 0x365   : > { %1483 = vmatpush.bf16.xpose.msrb.mxu1 %v1460_v9 }
 0x36d   : > { %1484 = vmatpush.bf16.xpose.msrb.mxu1 %v1457_v11 }
 0x375   : > { %1485 = vmatpush.bf16.xpose.msrb.mxu1 %v1454_v23 }
 0x37d   : > { %1486 = vmatpush.bf16.xpose.msrb.mxu1 %v1451_v39 }
 0x385   : > { %1487 = vmatpush.bf16.xpose.msrb.mxu1 %v1448_v14 }
 0x38d   : > { %1488 = vmatpush.bf16.xpose.msrb.mxu1 %v1445_v16 }
 0x391   : > { %v1477_v17 = vpop.f32.mrf.mxu0 }
 0x392   : > { %v1501_v20 = vadd.f32 %v1500_v26, %v1477_v17 }
 0x394   : > { %1826 = vmatmul.msk.bf16.vlgmr.msrb.gmra.mxu1 %vm751_vm3, %v1400_v10  ;;  %v1827_v21 = vmul.f32 -1.442695, %v1501_v20 }
 0x396   : > { %1910 = vpow2.f32 %v1827_v21 }
 0x399   : > { %v1479_v18 = vpop.f32.mrf.mxu0 }
 0x39c   : > { %v1911_v24 = vpop.eup %1910 }
 0x39d   : > { %v1509_v25 = vadd.f32 1.0, %v1911_v24 }
 0x39f   : > { %1912 = vrcp.f32 %v1509_v25  ;;  %vm1516_vm6 = vweird.f32 %v1509_v25  ;;  %v1522_v2 = vand.u32 2147483648, %v1509_v25  ;;  %v1520_v43 = vand.u32 2147483647, %v1509_v25 }
 0x3a1   : > { %v1523_v47 = vor.u32 1.1754944e-38, %v1522_v2  ;;  %vm1521_vm12 = vcmp.eq.f32.partialorder %v1520_v43, 8.507059e+37 }
 0x3a5   : > { %v1913_v29 = vpop.eup %1912 }
 0x3a6   : > { %v1512_v32 = vmul.f32 %v1913_v29, %v1509_v25  ;;  %vm1517_vm7 = vweird.f32 %v1913_v29 }
 0x3a7   : > { %vm2433_vm9 = vmor %vm1516_vm6, %vm1517_vm7 }
 0x3a8   : > { %v1513_v33 = vsub.f32 1.0, %v1512_v32 }
 0x3aa   : > { %v1514_v35 = vmul.f32 %v1913_v29, %v1513_v33 }
 0x3ac   : > { %v1515_v40 = vadd.f32 %v1913_v29, %v1514_v35 }
 0x3ae   : > { %v1519_v49 = vsel %vm2433_vm9, %v1913_v29, %v1515_v40 }
 0x3af   : > { %v1524_v36 = vsel %vm1521_vm12, %v1523_v47, %v1519_v49 }
 0x411   : > { %v1490_v27 = vpop.f32.mrf.mxu1 }
 0x412   : > { %v1502_v28 = vadd.f32 %v1500_v26, %v1490_v27 }
 0x414   : > { %v1828_v22 = vmul.f32 -1.442695, %v1502_v28 }
 0x416   : > { %1914 = vpow2.f32 %v1828_v22 }
 0x419   : > { %v1492_v13 = vpop.f32.mrf.mxu1 }
 0x41c   : > { %v1915_v30 = vpop.eup %1914 }
 0x41d   : > { %v1510_v31 = vadd.f32 1.0, %v1915_v30 }
 0x41f   : > { %1916 = vrcp.f32 %v1510_v31  ;;  %v1537_v41 = vand.u32 2147483648, %v1510_v31  ;;  %v1535_v44 = vand.u32 2147483647, %v1510_v31  ;;  %vm1531_vm10 = vweird.f32 %v1510_v31 }
 0x421   : > { %v1538_v48 = vor.u32 1.1754944e-38, %v1537_v41  ;;  %vm1536_vm13 = vcmp.eq.f32.partialorder %v1535_v44, 8.507059e+37 }
 0x425   : > { %v1917_v34 = vpop.eup %1916 }
 0x426   : > { %v1527_v15 = vmul.f32 %v1917_v34, %v1510_v31  ;;  %vm1532_vm8 = vweird.f32 %v1917_v34 }
 0x427   : > { %vm1533_vm11 = vmor %vm1531_vm10, %vm1532_vm8 }
 0x428   : > { %v1528_v38 = vsub.f32 1.0, %v1527_v15 }
 0x42a   : > { %v1529_v42 = vmul.f32 %v1917_v34, %v1528_v38 }
 0x42c   : > { %v1530_v46 = vadd.f32 %v1917_v34, %v1529_v42 }
 0x42e   : > { %v1534_v50 = vsel %vm1533_vm11, %v1917_v34, %v1530_v46 }
 0x42f   : > { %v1539_v51 = vsel %vm1536_vm13, %v1538_v48, %v1534_v50 }
 0x430   : > { %v1543_v53 = vrot.slane %v1539_v51, 7 }
 0x432   : > { %v1544_v54 = vsel %vm576_vm0, %v1524_v36, %v1543_v53 }
 0x433   : > { %1550 = vst.msk [vmem:[%s382_s10] sm:$0x3] %vm1548_vm14, %v1544_v54 }
 0x434   : > { %1945 = shalt.err (!%p1942_p3)
}
 0x435   : > { %1865 = dma.vmem_to_hbm [thread:$0]  (%p2084_p5), %s1565_s16, 32, %s1567_s17, %s1552_s18  }
 0x436 PF: > { %p1871_p4 = scmp.ge.s32.totalorder %s1980_s22, 2  ;;  %s1578_s26 = sand.u32 1, %s1968_s19  }
 0x437   : > { %s1579_s10 = scalar_lea.sflag [#allocation4], %s1578_s26 }
 0x438   : > { %p1868_p7 = pnand %p1871_p4, %p2088_p6 }
 0x43a   : > { %p1869_p8 = pneg %p1868_p7 }
 0x43c   : > { %1963 = dma.done.wait (%p1869_p8), %s1579_s10, 32  }
 0x43d   : > { %1965 = vsyncadd (%p1869_p8), %s1579_s10, 4294967264  ;;  %p23_p9 = scmp.ge.s32.totalorder %s2071_s24, 4   ;;  %s2489_s19 = smov %s1972_s20 }
 0x43e   : > { %s2490_s20 = smov %s1976_s21  ;;  %s2491_s21 = smov %s2082_s27 }
 0x43f   : > { %s2492_s22 = smov %s2071_s24  ;;  %25 = sbr.rel (!%p23_p9) target bundleno = 6 (0x6), region = 99 }
 0x444   :  { %1585 = vsyncpa [#allocation4], 1 }
 0x445   :  { %1587 = vsyncpa [#allocation4 + $0x1], 1 }

</bundles_post_ra>
